<compile_context>
chip_gen: v6e
topology: v6e:2x2x1
jax: 0.10.0
libtpu: 0.0.40
codegen_flags: <defaults>
</compile_context>

<pallas_src>
import jax
import jax.numpy as jnp
from jax.experimental import pallas as pl
from jax.experimental.pallas import tpu as pltpu

# lhs non-transposed, rhs transposed (both contract on their last dim)
_NT_DIM_NUMBERS = (((1,), (1,)), ((), ()))


def attention_kernel(x_ref, wa_ref, ba_ref, wc_ref, wf_ref, aw_ref):
    x = x_ref[...]                                    # (TB, D), native dtype

    # attention = Linear(input_dim, attention_dim); ReLU   (MXU, f32 accum)
    h = jnp.dot(x, wa_ref[...], preferred_element_type=jnp.float32) + ba_ref[...]
    h = jnp.maximum(h, 0.0)                           # (TB, A) f32

    wc = wc_ref[...]                                  # (1, A) f32

    # context = Linear(attention_dim, 1, bias=False)
    # Sublane-oriented score (one scalar per row) via VPU multiply + XLU lane
    # reduction -- avoids an N=1 MXU matmul for the value we broadcast over x.
    s_col = jnp.sum(h * wc, axis=-1, keepdims=True)   # (TB, 1)

    # softmax over the size-1 context axis: the max equals s and the sum has a
    # single term, so softmax(s) == exp(s - s) exactly.
    a_col = jnp.exp(s_col - s_col)                    # (TB, 1)

    wf_ref[...] = (x * a_col).astype(wf_ref.dtype)    # (TB, D)

    # Lane-oriented copy of the same score so the attention-weight output is
    # stored lane-dense ((1, TB) slab -> unmasked stores).  NT matmul; the 8
    # broadcast rows are identical, row 0 is kept.
    wc8 = jnp.broadcast_to(wc, (8, wc.shape[-1]))     # (8, A)
    s_row = jax.lax.dot_general(wc8, h, _NT_DIM_NUMBERS,
                                preferred_element_type=jnp.float32)  # (8, TB)
    a_row = jnp.exp(s_row - s_row)                    # (8, TB)
    aw_ref[...] = a_row[0:1, :].astype(aw_ref.dtype)  # (1, TB)


def _default_tile_b(batch):
    # Prefer lane-aligned tiles (multiple of 128) so the (1, tile_b) attention
    # weight block is legal with grid > 1 and large enough to amortise the
    # ~0.35 us per-step pipeline overhead; fall back to the whole batch.
    for t in (2048, 1024, 512, 256, 128):
        if batch % t == 0:
            return t
    return batch


def attention_feature_extractor(x, w_att, b_att, w_ctx, *, tile_b=None):
    B, D = x.shape
    A = w_att.shape[1]
    if tile_b is None:
        tile_b = _default_tile_b(B)
    assert B % tile_b == 0, "batch must be divisible by tile_b"
    # (8,128) BlockSpec legality: partial tiles must be lane/sublane aligned.
    assert tile_b == B or tile_b % 128 == 0, \
        "tile_b must equal the batch or be a multiple of 128"

    b_att2 = b_att.reshape(1, A)      # bias as a broadcastable row
    w_ctx2 = w_ctx.reshape(1, A)      # context weight as a lane-dense row

    grid = (B // tile_b,)
    out_shapes = (
        jax.ShapeDtypeStruct((B, D), x.dtype),   # weighted_features
        jax.ShapeDtypeStruct((1, B), x.dtype),   # attention_weights (lane-dense)
    )

    wf, aw_row = pl.pallas_call(
        attention_kernel,
        out_shape=out_shapes,
        grid_spec=pltpu.PrefetchScalarGridSpec(
            num_scalar_prefetch=0,
            grid=grid,
            in_specs=[
                pl.BlockSpec((tile_b, D), lambda i: (i, 0)),   # x tile
                pl.BlockSpec((D, A), lambda i: (0, 0)),        # W_att (resident)
                pl.BlockSpec((1, A), lambda i: (0, 0)),        # b_att (resident)
                pl.BlockSpec((1, A), lambda i: (0, 0)),        # w_ctx row (resident)
            ],
            out_specs=[
                pl.BlockSpec((tile_b, D), lambda i: (i, 0)),   # weighted features
                pl.BlockSpec((1, tile_b), lambda i: (0, i)),   # attention weights
            ],
        ),
        compiler_params=pltpu.CompilerParams(
            dimension_semantics=("parallel",),
            vmem_limit_bytes=64 * 1024 * 1024,
        ),
    )(x, w_att, b_att2, w_ctx2)

    return wf, aw_row.reshape(B, 1)


def reference(x, w_att, b_att, w_ctx):
    h = jnp.maximum(x @ w_att + b_att, 0.0)
    s = h @ w_ctx
    a = jax.nn.softmax(s, axis=1)
    return x * a, a


if __name__ == "__main__":
    # small shapes consistent with the module: tabular batch of feature vectors
    B = 256            # batch (multiple tiles when tile_b=128)
    input_dim = 32
    attention_dim = 64

    key = jax.random.PRNGKey(0)
    kx, kw1, kb1, kw2 = jax.random.split(key, 4)

    x = jax.random.normal(kx, (B, input_dim), dtype=jnp.float32)

    # deterministic parameter init (PyTorch-Linear-like uniform fan-in scaling)
    bound1 = 1.0 / (input_dim ** 0.5)
    w_att = jax.random.uniform(kw1, (input_dim, attention_dim),
                               minval=-bound1, maxval=bound1, dtype=jnp.float32)
    b_att = jax.random.uniform(kb1, (attention_dim,),
                               minval=-bound1, maxval=bound1, dtype=jnp.float32)
    bound2 = 1.0 / (attention_dim ** 0.5)
    w_ctx = jax.random.uniform(kw2, (attention_dim, 1),
                               minval=-bound2, maxval=bound2, dtype=jnp.float32)

    ref_w, ref_a = reference(x, w_att, b_att, w_ctx)

    # exercise both the default single-tile path and a multi-tile grid (grid=2)
    for tb in (None, 128):
        weighted, attn = attention_feature_extractor(x, w_att, b_att, w_ctx, tile_b=tb)
        jax.block_until_ready((weighted, attn))
        assert weighted.shape == (B, input_dim)
        assert attn.shape == (B, 1)
        assert jnp.allclose(weighted, ref_w, atol=1e-5, rtol=1e-5)
        assert jnp.allclose(attn, ref_a, atol=1e-5, rtol=1e-5)

    print("KERNEL_OK")
</pallas_src>

<mosaic_0001>
module attributes {stable_mosaic.version = 11 : i64} {
  func.func @attention_kernel(%arg0: i32, %arg1: memref<256x32xf32, #tpu.memory_space<vmem>>, %arg2: memref<32x64xf32, #tpu.memory_space<vmem>>, %arg3: memref<1x64xf32, #tpu.memory_space<vmem>>, %arg4: memref<1x64xf32, #tpu.memory_space<vmem>>, %arg5: memref<256x32xf32, #tpu.memory_space<vmem>>, %arg6: memref<1x256xf32, #tpu.memory_space<vmem>>) attributes {dimension_semantics = [#tpu.dimension_semantics<parallel>], iteration_bounds = array<i64: 1>, scalar_prefetch = 0 : i64, scratch_operands = 0 : i64, tpu.core_type = #tpu.core_type<tc>, window_params = [{transform_indices = @transform_0, window_bounds = array<i64: 256, 32>}, {pipeline_mode = #tpu.pipeline_mode<synchronous>, transform_indices = @transform_1, window_bounds = array<i64: 32, 64>}, {pipeline_mode = #tpu.pipeline_mode<synchronous>, transform_indices = @transform_2, window_bounds = array<i64: 1, 64>}, {pipeline_mode = #tpu.pipeline_mode<synchronous>, transform_indices = @transform_3, window_bounds = array<i64: 1, 64>}, {transform_indices = @transform_4, window_bounds = array<i64: 256, 32>}, {transform_indices = @transform_5, window_bounds = array<i64: 1, 256>}]} {
    %c0 = arith.constant 0 : index
    %c0_0 = arith.constant 0 : index
    %0 = vector.load %arg1[%c0, %c0_0] : memref<256x32xf32, #tpu.memory_space<vmem>>, vector<256x32xf32>
    %c0_1 = arith.constant 0 : index
    %c0_2 = arith.constant 0 : index
    %1 = vector.load %arg2[%c0_1, %c0_2] : memref<32x64xf32, #tpu.memory_space<vmem>>, vector<32x64xf32>
    %cst = arith.constant dense<0.000000e+00> : vector<256x64xf32>
    %2 = tpu.matmul %0, %1, %cst {dimension_numbers = #tpu.dot_dimension_numbers<[1], [0], [0], [1], [0, 0, 1, 1], [], []>} : vector<256x32xf32>, vector<32x64xf32>, vector<256x64xf32> -> vector<256x64xf32>
    %c0_3 = arith.constant 0 : index
    %c0_4 = arith.constant 0 : index
    %3 = vector.load %arg3[%c0_3, %c0_4] : memref<1x64xf32, #tpu.memory_space<vmem>>, vector<1x64xf32>
    %4 = vector.broadcast %3 : vector<1x64xf32> to vector<256x64xf32>
    %5 = arith.addf %2, %4 : vector<256x64xf32>
    %cst_5 = arith.constant 0.000000e+00 : f32
    %6 = vector.broadcast %cst_5 : f32 to vector<256x64xf32>
    %7 = arith.maximumf %5, %6 : vector<256x64xf32>
    %c0_6 = arith.constant 0 : index
    %c0_7 = arith.constant 0 : index
    %8 = vector.load %arg4[%c0_6, %c0_7] : memref<1x64xf32, #tpu.memory_space<vmem>>, vector<1x64xf32>
    %9 = vector.broadcast %8 : vector<1x64xf32> to vector<256x64xf32>
    %10 = arith.mulf %7, %9 : vector<256x64xf32>
    %cst_8 = arith.constant dense<0.000000e+00> : vector<256xf32>
    %11 = vector.multi_reduction <add>, %10, %cst_8 [1] : vector<256x64xf32> to vector<256xf32>
    %12 = vector.shape_cast %11 : vector<256xf32> to vector<256x1xf32>
    %13 = arith.subf %12, %12 : vector<256x1xf32>
    %14 = math.exp %13 : vector<256x1xf32>
    %15 = vector.broadcast %14 : vector<256x1xf32> to vector<256x32xf32>
    %16 = arith.mulf %0, %15 : vector<256x32xf32>
    %c0_9 = arith.constant 0 : index
    %c0_10 = arith.constant 0 : index
    %17 = vector.load %arg5[%c0_9, %c0_10] : memref<256x32xf32, #tpu.memory_space<vmem>>, vector<256x32xf32>
    tpu.vector_store %arg5[%c0_9, %c0_10], %16 {strides = array<i32>} : memref<256x32xf32, #tpu.memory_space<vmem>>, vector<256x32xf32>,
    %18 = vector.shape_cast %8 : vector<1x64xf32> to vector<1x64xf32>
    %19 = vector.broadcast %18 : vector<1x64xf32> to vector<8x64xf32>
    %cst_11 = arith.constant dense<0.000000e+00> : vector<8x256xf32>
    %20 = tpu.matmul %19, %7, %cst_11 {dimension_numbers = #tpu.dot_dimension_numbers<[1], [1], [0], [0], [0, 0, 1, 0], [], []>} : vector<8x64xf32>, vector<256x64xf32>, vector<8x256xf32> -> vector<8x256xf32>
    %21 = arith.subf %20, %20 : vector<8x256xf32>
    %22 = math.exp %21 : vector<8x256xf32>
    %23 = vector.extract_strided_slice %22 {offsets = [0, 0], sizes = [1, 256], strides = [1, 1]} : vector<8x256xf32> to vector<1x256xf32>
    %c0_12 = arith.constant 0 : index
    %c0_13 = arith.constant 0 : index
    %24 = vector.load %arg6[%c0_12, %c0_13] : memref<1x256xf32, #tpu.memory_space<vmem>>, vector<1x256xf32>
    tpu.vector_store %arg6[%c0_12, %c0_13], %23 {strides = array<i32>} : memref<1x256xf32, #tpu.memory_space<vmem>>, vector<1x256xf32>,
    return
  }
  func.func @transform_0(%arg0: i32) -> (i32, i32) {
    %c0_i32 = arith.constant 0 : i32
    %c0_i32_0 = arith.constant 0 : i32
    return %arg0, %c0_i32 : i32, i32
  }
  func.func @transform_1(%arg0: i32) -> (i32, i32) {
    %c0_i32 = arith.constant 0 : i32
    %c0_i32_0 = arith.constant 0 : i32
    %c0_i32_1 = arith.constant 0 : i32
    return %c0_i32, %c0_i32_0 : i32, i32
  }
  func.func @transform_2(%arg0: i32) -> (i32, i32) {
    %c0_i32 = arith.constant 0 : i32
    %c0_i32_0 = arith.constant 0 : i32
    %c0_i32_1 = arith.constant 0 : i32
    return %c0_i32, %c0_i32_0 : i32, i32
  }
  func.func @transform_3(%arg0: i32) -> (i32, i32) {
    %c0_i32 = arith.constant 0 : i32
    %c0_i32_0 = arith.constant 0 : i32
    %c0_i32_1 = arith.constant 0 : i32
    return %c0_i32, %c0_i32_0 : i32, i32
  }
  func.func @transform_4(%arg0: i32) -> (i32, i32) {
    %c0_i32 = arith.constant 0 : i32
    %c0_i32_0 = arith.constant 0 : i32
    return %arg0, %c0_i32 : i32, i32
  }
  func.func @transform_5(%arg0: i32) -> (i32, i32) {
    %c0_i32 = arith.constant 0 : i32
    %c0_i32_0 = arith.constant 0 : i32
    return %c0_i32, %arg0 : i32, i32
  }
}

</mosaic_0001>

<bundles_post_ra>
// kernel: tpu_custom_call.1
= control target key start
LH: loop header
LB: loop body
LE: loop exit
PB: predicated region body
PF: predicated region fallthrough
CT: control target
= control target key end

     0   :  { %vm63_vm0 = vcmask 261120   ;;  %s1965_s0 = inlined_call_operand.vmem [shape: f32[256,32], index: 0, kind: input, shape index: {}]   ;;  %s1966_s1 = inlined_call_operand.vmem [shape: f32[32,64], index: 1, kind: input, shape index: {}]   ;;  %s1967_s2 = inlined_call_operand.vmem [shape: f32[1,64], index: 2, kind: input, shape index: {}]   ;;  %s1968_s3 = inlined_call_operand.vmem [shape: f32[1,64], index: 3, kind: input, shape index: {}]   ;;  %s1969_s4 = inlined_call_operand.vmem [shape: f32[256,32], index: 4, kind: output, shape index: {0}]   ;;  %s1970_s5 = inlined_call_operand.hbm [shape: f32[1,256], index: 5, kind: output, shape index: {1}]  }
   0x1   :  { %v55_v0 = vld [vmem:[%s1966_s1 + $0x18] sm:$0xff]  ;;  %v54_v1 = vld [vmem:[%s1966_s1 + $0x10] sm:$0xff]  ;;  %v1255_v2 = vld [vmem:[%s1965_s0] sm:$0xff] }
   0x2   :  { %1066 = vmatprep.subr.mxu0 %v55_v0  ;;  %v53_v3 = vld [vmem:[%s1966_s1 + $0x8] sm:$0xff]  ;;  %1074 = vmatprep.mubr.msk.f32.mxu0 %vm63_vm0, %v1255_v2  ;;  %v52_v4 = vld [vmem:[%s1966_s1] sm:$0xff]  ;;  %v1273_v6 = vld [vmem:[%s1965_s0 + $0x10] sm:$0xff] }
   0x3   :  { %1067 = vmatpush3.msra.mxu0 %v55_v0  ;;  %v1268_v5 = vld [vmem:[%s1965_s0 + $0x8] sm:$0xff]  ;;  %v1282_v7 = vld [vmem:[%s1965_s0 + $0x18] sm:$0xff]  ;;  %v1287_v8 = vld [vmem:[%s1965_s0 + $0x20] sm:$0xff] }
   0x4   :  { %1068 = vmatprep.subr.mxu0 %v54_v1 }
   0x5   :  { %1069 = vmatpush3.msra.mxu0 %v54_v1 }
   0x6   :  { %1070 = vmatprep.subr.mxu0 %v53_v3 }
   0x7   :  { %1071 = vmatpush3.msra.mxu0 %v53_v3 }
   0x8   :  { %1072 = vmatprep.subr.mxu0 %v52_v4 }
   0x9   :  { %1073 = vmatpush3.msra.mxu0 %v52_v4 }
   0xa   :  { %1075 = vmatmul.mubr.msk.f32.vlgmr.msra.gmra.mxu0 %vm63_vm0, %v1268_v5 }
   0xb   :  { %1077 = vmatprep.mubr.msk.f32.mxu0 %vm63_vm0, %v1273_v6 }
   0xc   :  { %11 = vsyncpa [#allocation3], 0  ;;  %v1296_v9 = vld [vmem:[%s1965_s0 + $0x28] sm:$0xff]  ;;  %v1301_v10 = vld [vmem:[%s1965_s0 + $0x30] sm:$0xff]  ;;  %vm456_vm1 = vcmask 523264   ;;  %s1215_s19 = smov [#allocation2]  }
   0xd   :  { %v1310_v11 = vld [vmem:[%s1965_s0 + $0x38] sm:$0xff]  ;;  %v1315_v12 = vld [vmem:[%s1965_s0 + $0x40] sm:$0xff]  ;;  %v1324_v13 = vld [vmem:[%s1965_s0 + $0x48] sm:$0xff]  ;;  %s919_s20 = sshll.u32 %s1215_s19, 4  ;;  %s920_s20 = int_to_ptr.vmem [resolvable:$true] %s919_s20 }
   0xe   :  { %1078 = vmatmul.mubr.msk.f32.gmra.mxu0 %vm63_vm0, %v1282_v7  ;;  %v1329_v14 = vld [vmem:[%s1965_s0 + $0x50] sm:$0xff]  ;;  %v1338_v15 = vld [vmem:[%s1965_s0 + $0x58] sm:$0xff]  ;;  %v1343_v16 = vld [vmem:[%s1965_s0 + $0x60] sm:$0xff]  ;;  %p1197_p1 = scmp.lt.s32.totalorder %s920_s20, %s920_s20 }
   0xf   :  { %1080 = vmatprep.mubr.msk.f32.mxu0 %vm63_vm0, %v1287_v8  ;;  %v1352_v17 = vld [vmem:[%s1965_s0 + $0x68] sm:$0xff]  ;;  %v1357_v18 = vld [vmem:[%s1965_s0 + $0x70] sm:$0xff]  ;;  %v1366_v19 = vld [vmem:[%s1965_s0 + $0x78] sm:$0xff] }
  0x10   :  { %v1371_v20 = vld [vmem:[%s1965_s0 + $0x80] sm:$0xff]  ;;  %v1380_v21 = vld [vmem:[%s1965_s0 + $0x88] sm:$0xff]  ;;  %v1385_v22 = vld [vmem:[%s1965_s0 + $0x90] sm:$0xff] }
  0x11   :  { %2005 = vst [vmem:[#allocation5_spill] sm:$0xff] %v1385_v22  ;;  %v1394_v23 = vld [vmem:[%s1965_s0 + $0x98] sm:$0xff]  ;;  %v1399_v24 = vld [vmem:[%s1965_s0 + $0xa0] sm:$0xff]  ;;  %v1408_v25 = vld [vmem:[%s1965_s0 + $0xa8] sm:$0xff] }
  0x12   :  { %1081 = vmatmul.mubr.msk.f32.gmra.mxu0 %vm63_vm0, %v1296_v9  ;;  %2006 = vst [vmem:[#allocation6_spill] sm:$0xff] %v1394_v23  ;;  %2007 = vst [vmem:[#allocation7_spill] sm:$0xff] %v1399_v24  ;;  %v1413_v26 = vld [vmem:[%s1965_s0 + $0xb0] sm:$0xff]  ;;  %v1422_v27 = vld [vmem:[%s1965_s0 + $0xb8] sm:$0xff] }
  0x13   :  { %1083 = vmatprep.mubr.msk.f32.mxu0 %vm63_vm0, %v1301_v10  ;;  %2008 = vst [vmem:[#allocation8_spill] sm:$0xff] %v1408_v25  ;;  %2009 = vst [vmem:[#allocation9_spill] sm:$0xff] %v1413_v26  ;;  %v1427_v28 = vld [vmem:[%s1965_s0 + $0xc0] sm:$0xff]  ;;  %v1436_v29 = vld [vmem:[%s1965_s0 + $0xc8] sm:$0xff] }
  0x14   :  { %2010 = vst [vmem:[#allocation10_spill] sm:$0xff] %v1422_v27  ;;  %2011 = vst [vmem:[#allocation11_spill] sm:$0xff] %v1427_v28  ;;  %v1441_v30 = vld [vmem:[%s1965_s0 + $0xd0] sm:$0xff]  ;;  %v1450_v31 = vld [vmem:[%s1965_s0 + $0xd8] sm:$0xff] }
  0x15   :  { %2012 = vst [vmem:[#allocation12_spill] sm:$0xff] %v1436_v29  ;;  %2013 = vst [vmem:[#allocation13_spill] sm:$0xff] %v1441_v30  ;;  %v1455_v32 = vld [vmem:[%s1965_s0 + $0xe0] sm:$0xff]  ;;  %v1464_v33 = vld [vmem:[%s1965_s0 + $0xe8] sm:$0xff] }
  0x16   :  { %1084 = vmatmul.mubr.msk.f32.gmra.mxu0 %vm63_vm0, %v1310_v11  ;;  %2014 = vst [vmem:[#allocation14_spill] sm:$0xff] %v1450_v31  ;;  %2015 = vst [vmem:[#allocation15_spill] sm:$0xff] %v1455_v32  ;;  %v1469_v34 = vld [vmem:[%s1965_s0 + $0xf0] sm:$0xff]  ;;  %v1478_v35 = vld [vmem:[%s1965_s0 + $0xf8] sm:$0xff] }
  0x17   :  { %1086 = vmatprep.mubr.msk.f32.mxu0 %vm63_vm0, %v1315_v12  ;;  %2016 = vst [vmem:[#allocation16_spill] sm:$0xff] %v1464_v33  ;;  %2017 = vst [vmem:[#allocation17_spill] sm:$0xff] %v1469_v34  ;;  %v1485_v36 = vld [vmem:[%s1968_s3] ss:$0 sm:$0xff] }
  0x18   :  { %2018 = vst [vmem:[#allocation18_spill] sm:$0xff] %v1478_v35  ;;  %1064 = vmatprep.mubr.msk.f32.mxu1 %vm456_vm1, %v1485_v36  ;;  %v1492_v37 = vld [vmem:[%s1967_s2] ss:$0 sm:$0xff] }
  0x1a   :  { %1087 = vmatmul.mubr.msk.f32.gmra.mxu0 %vm63_vm0, %v1324_v13 }
  0x1b   :  { %1089 = vmatprep.mubr.msk.f32.mxu0 %vm63_vm0, %v1329_v14 }
  0x1e   :  { %1090 = vmatmul.mubr.msk.f32.gmra.mxu0 %vm63_vm0, %v1338_v15 }
  0x1f   :  { %1092 = vmatprep.mubr.msk.f32.mxu0 %vm63_vm0, %v1343_v16 }
  0x22   :  { %1093 = vmatmul.mubr.msk.f32.gmra.mxu0 %vm63_vm0, %v1352_v17 }
  0x23   :  { %1095 = vmatprep.mubr.msk.f32.mxu0 %vm63_vm0, %v1357_v18 }
  0x26   :  { %1096 = vmatmul.mubr.msk.f32.gmra.mxu0 %vm63_vm0, %v1366_v19 }
  0x27   :  { %1098 = vmatprep.mubr.msk.f32.mxu0 %vm63_vm0, %v1371_v20 }
  0x2a   :  { %1099 = vmatmul.mubr.msk.f32.gmra.mxu0 %vm63_vm0, %v1380_v21 }
  0x2b   :  { %1101 = vmatprep.mubr.msk.f32.mxu0 %vm63_vm0, %v1385_v22 }
  0x2e   :  { %1102 = vmatmul.mubr.msk.f32.gmra.mxu0 %vm63_vm0, %v1394_v23 }
  0x2f   :  { %1104 = vmatprep.mubr.msk.f32.mxu0 %vm63_vm0, %v1399_v24 }
  0x32   :  { %1105 = vmatmul.mubr.msk.f32.gmra.mxu0 %vm63_vm0, %v1408_v25 }
  0x33   :  { %1107 = vmatprep.mubr.msk.f32.mxu0 %vm63_vm0, %v1413_v26 }
  0x36   :  { %1108 = vmatmul.mubr.msk.f32.gmra.mxu0 %vm63_vm0, %v1422_v27 }
  0x37   :  { %1110 = vmatprep.mubr.msk.f32.mxu0 %vm63_vm0, %v1427_v28 }
  0x3a   :  { %1111 = vmatmul.mubr.msk.f32.gmra.mxu0 %vm63_vm0, %v1436_v29 }
  0x3b   :  { %1113 = vmatprep.mubr.msk.f32.mxu0 %vm63_vm0, %v1441_v30 }
  0x3e   :  { %1114 = vmatmul.mubr.msk.f32.gmra.mxu0 %vm63_vm0, %v1450_v31 }
  0x3f   :  { %1116 = vmatprep.mubr.msk.f32.mxu0 %vm63_vm0, %v1455_v32 }
  0x42   :  { %1117 = vmatmul.mubr.msk.f32.gmra.mxu0 %vm63_vm0, %v1464_v33 }
  0x43   :  { %1119 = vmatprep.mubr.msk.f32.mxu0 %vm63_vm0, %v1469_v34 }
  0x46   :  { %1120 = vmatmul.mubr.msk.f32.gmra.mxu0 %vm63_vm0, %v1478_v35 }
  0xca   :  { %v1076_v38 = vpop.f32.mrf.mxu0 }
  0xcb   :  { %v1495_v39 = vadd.f32 %v1076_v38, %v1492_v37 }
  0xcc   :  { %v226_v40 = vpop.f32.mrf.mxu0 }
  0xcd   :  { %v1972_v41 = vmax.f32 %v1495_v39, 0.0  ;;  %v1499_v42 = vadd.f32 %v1492_v37, %v226_v40 }
  0xce   :  { %v1079_v43 = vpop.f32.mrf.mxu0 }
  0xcf   :  { %v1971_v44 = vmax.f32 %v1499_v42, 0.0  ;;  %v1503_v45 = vadd.f32 %v1079_v43, %v1492_v37  ;;  %v425_v46 = vmul.f32 %v1485_v36, %v1972_v41 }
  0xd0   :  { %v236_v47 = vpop.f32.mrf.mxu0 }
  0xd1   :  { %v1974_v48 = vmax.f32 %v1503_v45, 0.0  ;;  %v1510_v49 = vadd.f32 %v1492_v37, %v236_v47  ;;  %v460_v50 = vsel %vm456_vm1, %v425_v46, 0.0  ;;  %v424_v51 = vmul.f32 %v1485_v36, %v1971_v44 }
  0xd2   :  { %461 = vadd.xlane.f32.xlu0 %v460_v50  ;;  %v1082_v52 = vpop.f32.mrf.mxu0 }
  0xd3   :  { %v1973_v53 = vmax.f32 %v1510_v49, 0.0  ;;  %v1518_v54 = vadd.f32 %v1082_v52, %v1492_v37  ;;  %v427_v55 = vmul.f32 %v1485_v36, %v1974_v48  ;;  %v457_v57 = vsel %vm456_vm1, %v424_v51, 0.0 }
  0xd4   :  { %v246_v56 = vpop.f32.mrf.mxu0 }
  0xd5   :  { %v1976_v58 = vmax.f32 %v1518_v54, 0.0  ;;  %v1526_v59 = vadd.f32 %v1492_v37, %v246_v56  ;;  %v466_v60 = vsel %vm456_vm1, %v427_v55, 0.0  ;;  %v426_v61 = vmul.f32 %v1485_v36, %v1973_v53 }
  0xd6   :  { %467 = vadd.xlane.f32.xlu1 %v466_v60  ;;  %v1085_v62 = vpop.f32.mrf.mxu0  ;;  %458 = vadd.xlane.f32.xlu0 %v457_v57 }
  0xd7   :  { %v1975_v63 = vmax.f32 %v1526_v59, 0.0  ;;  %v1534_v0 = vadd.f32 %v1085_v62, %v1492_v37  ;;  %v463_v3 = vsel %vm456_vm1, %v426_v61, 0.0  ;;  %v429_v43 = vmul.f32 %v1485_v36, %v1976_v58 }
  0xd8   :  { %v256_v1 = vpop.f32.mrf.mxu0 }
  0xd9   :  { %v1978_v4 = vmax.f32 %v1534_v0, 0.0  ;;  %v1539_v38 = vadd.f32 %v1492_v37, %v256_v1  ;;  %v428_v40 = vmul.f32 %v1485_v36, %v1975_v63  ;;  %v472_v60 = vsel %vm456_vm1, %v429_v43, 0.0 }
  0xda   :  { %v1088_v46 = vpop.f32.mrf.mxu0  ;;  %464 = vadd.xlane.f32.xlu1 %v463_v3 }
  0xdb   :  { %v1977_v47 = vmax.f32 %v1539_v38, 0.0  ;;  %v1549_v50 = vadd.f32 %v1088_v46, %v1492_v37  ;;  %v469_v51 = vsel %vm456_vm1, %v428_v40, 0.0  ;;  %v431_v55 = vmul.f32 %v1485_v36, %v1978_v4 }
  0xdc   :  { %v266_v52 = vpop.f32.mrf.mxu0  ;;  %470 = vadd.xlane.f32.xlu0 %v469_v51 }
  0xdd   :  { %v1980_v56 = vmax.f32 %v1549_v50, 0.0  ;;  %v1557_v57 = vadd.f32 %v1492_v37, %v266_v52  ;;  %v430_v61 = vmul.f32 %v1485_v36, %v1977_v47  ;;  %v478_v51 = vsel %vm456_vm1, %v431_v55, 0.0 }
  0xde   :  { %v1091_v62 = vpop.f32.mrf.mxu0  ;;  %473 = vadd.xlane.f32.xlu1 %v472_v60 }
  0xdf   :  { %v1979_v1 = vmax.f32 %v1557_v57, 0.0  ;;  %v1565_v3 = vadd.f32 %v1091_v62, %v1492_v37  ;;  %v475_v40 = vsel %vm456_vm1, %v430_v61, 0.0  ;;  %v433_v62 = vmul.f32 %v1485_v36, %v1980_v56 }
  0xe0   :  { %v276_v46 = vpop.f32.mrf.mxu0  ;;  %476 = vadd.xlane.f32.xlu0 %v475_v40 }
  0xe1   :  { %v1982_v52 = vmax.f32 %v1565_v3, 0.0  ;;  %v1571_v43 = vadd.f32 %v1492_v37, %v276_v46  ;;  %v432_v60 = vmul.f32 %v1485_v36, %v1979_v1 }
  0xe2   :  { %v1094_v44 = vpop.f32.mrf.mxu0  ;;  %479 = vadd.xlane.f32.xlu1 %v478_v51  ;;  %v484_v51 = vsel %vm456_vm1, %v433_v62, 0.0 }
  0xe3   :  { %v1981_v61 = vmax.f32 %v1571_v43, 0.0  ;;  %v1581_v40 = vadd.f32 %v1094_v44, %v1492_v37  ;;  %v481_v55 = vsel %vm456_vm1, %v432_v60, 0.0  ;;  %v435_v46 = vmul.f32 %v1485_v36, %v1982_v52 }
  0xe4   :  { %v286_v41 = vpop.f32.mrf.mxu0  ;;  %482 = vadd.xlane.f32.xlu0 %v481_v55 }
  0xe5   :  { %v1984_v53 = vmax.f32 %v1581_v40, 0.0  ;;  %v1589_v48 = vadd.f32 %v1492_v37, %v286_v41  ;;  %v434_v44 = vmul.f32 %v1485_v36, %v1981_v61  ;;  %v490_v41 = vsel %vm456_vm1, %v435_v46, 0.0 }
  0xe6   :  { %v1097_v63 = vpop.f32.mrf.mxu0  ;;  %485 = vadd.xlane.f32.xlu1 %v484_v51 }
  0xe7   :  { %v1983_v60 = vmax.f32 %v1589_v48, 0.0  ;;  %v1597_v55 = vadd.f32 %v1097_v63, %v1492_v37  ;;  %v487_v58 = vsel %vm456_vm1, %v434_v44, 0.0  ;;  %v437_v63 = vmul.f32 %v1485_v36, %v1984_v53 }
  0xe8   :  { %v296_v47 = vpop.f32.mrf.mxu0  ;;  %488 = vadd.xlane.f32.xlu0 %v487_v58 }
  0xe9   :  { %v1985_v4 = vmax.f32 %v1597_v55, 0.0  ;;  %v1603_v62 = vadd.f32 %v1492_v37, %v296_v47  ;;  %v436_v51 = vmul.f32 %v1485_v36, %v1983_v60 }
  0xea   :  { %v1100_v1 = vpop.f32.mrf.mxu0  ;;  %491 = vadd.xlane.f32.xlu1 %v490_v41  ;;  %v496_v41 = vsel %vm456_vm1, %v437_v63, 0.0 }
  0xeb   :  { %v1986_v44 = vmax.f32 %v1603_v62, 0.0  ;;  %v1613_v58 = vadd.f32 %v1100_v1, %v1492_v37  ;;  %v493_v46 = vsel %vm456_vm1, %v436_v51, 0.0  ;;  %v439_v47 = vmul.f32 %v1485_v36, %v1985_v4 }
  0xec   :  { %v306_v56 = vpop.f32.mrf.mxu0  ;;  %494 = vadd.xlane.f32.xlu0 %v493_v46 }
  0xed   :  { %v1621_v52 = vadd.f32 %v1492_v37, %v306_v56  ;;  %v438_v1 = vmul.f32 %v1485_v36, %v1986_v44  ;;  %v502_v56 = vsel %vm456_vm1, %v439_v47, 0.0  ;;  %v2019_v44 = vmax.f32 %v1613_v58, 0.0 }
  0xee   :  { %v1103_v60 = vpop.f32.mrf.mxu0  ;;  %497 = vadd.xlane.f32.xlu1 %v496_v41 }
  0xef   :  { %v1989_v51 = vmax.f32 %v1621_v52, 0.0  ;;  %v1629_v46 = vadd.f32 %v1103_v60, %v1492_v37  ;;  %v499_v53 = vsel %vm456_vm1, %v438_v1, 0.0  ;;  %v441_v60 = vmul.f32 %v1485_v36, %v2019_v44 }
  0xf0   :  { %v316_v4 = vpop.f32.mrf.mxu0  ;;  %500 = vadd.xlane.f32.xlu0 %v499_v53 }
  0xf1   :  { %v1635_v63 = vadd.f32 %v1492_v37, %v316_v4  ;;  %v440_v41 = vmul.f32 %v1485_v36, %v1989_v51  ;;  %v2020_v4 = vmax.f32 %v1629_v46, 0.0  ;;  %v508_v44 = vsel %vm456_vm1, %v441_v60, 0.0 }
  0xf2   :  { %v1106_v35 = vpop.f32.mrf.mxu0  ;;  %503 = vadd.xlane.f32.xlu1 %v502_v56 }
  0xf3   :  { %v1992_v1 = vmax.f32 %v1635_v63, 0.0  ;;  %v1645_v53 = vadd.f32 %v1106_v35, %v1492_v37  ;;  %v505_v47 = vsel %vm456_vm1, %v440_v41, 0.0  ;;  %v443_v34 = vmul.f32 %v1485_v36, %v2020_v4 }
  0xf4   :  { %v326_v61 = vpop.f32.mrf.mxu0  ;;  %506 = vadd.xlane.f32.xlu0 %v505_v47 }
  0xf5   :  { %v1653_v33 = vadd.f32 %v1492_v37, %v326_v61  ;;  %v442_v35 = vmul.f32 %v1485_v36, %v1992_v1  ;;  %v514_v61 = vsel %vm456_vm1, %v443_v34, 0.0  ;;  %v2021_v1 = vmax.f32 %v1645_v53, 0.0 }
  0xf6   :  { %v1109_v56 = vpop.f32.mrf.mxu0  ;;  %509 = vadd.xlane.f32.xlu1 %v508_v44 }
  0xf7   :  { %v1995_v41 = vmax.f32 %v1653_v33, 0.0  ;;  %v1661_v47 = vadd.f32 %v1109_v56, %v1492_v37  ;;  %v511_v4 = vsel %vm456_vm1, %v442_v35, 0.0  ;;  %v445_v56 = vmul.f32 %v1485_v36, %v2021_v1 }
  0xf8   :  { %v336_v32 = vpop.f32.mrf.mxu0  ;;  %512 = vadd.xlane.f32.xlu0 %v511_v4 }
  0xf9   :  { %v1667_v60 = vadd.f32 %v1492_v37, %v336_v32  ;;  %v444_v44 = vmul.f32 %v1485_v36, %v1995_v41  ;;  %v2022_v32 = vmax.f32 %v1661_v47, 0.0  ;;  %v520_v1 = vsel %vm456_vm1, %v445_v56, 0.0 }
  0xfa   :  { %v1112_v31 = vpop.f32.mrf.mxu0  ;;  %515 = vadd.xlane.f32.xlu1 %v514_v61 }
  0xfb   :  { %v2000_v35 = vmax.f32 %v1667_v60, 0.0  ;;  %v1677_v4 = vadd.f32 %v1112_v31, %v1492_v37  ;;  %v517_v34 = vsel %vm456_vm1, %v444_v44, 0.0  ;;  %v447_v30 = vmul.f32 %v1485_v36, %v2022_v32 }
  0xfc   :  { %v346_v51 = vpop.f32.mrf.mxu0  ;;  %518 = vadd.xlane.f32.xlu0 %v517_v34 }
  0xfd   :  { %v1685_v29 = vadd.f32 %v1492_v37, %v346_v51  ;;  %v446_v31 = vmul.f32 %v1485_v36, %v2000_v35  ;;  %v526_v41 = vsel %vm456_vm1, %v447_v30, 0.0  ;;  %v2023_v26 = vmax.f32 %v1677_v4, 0.0 }
  0xfe   :  { %v1115_v61 = vpop.f32.mrf.mxu0  ;;  %521 = vadd.xlane.f32.xlu1 %v520_v1 }
  0xff   :  { %v409_v44 = vmax.f32 %v1685_v29, 0.0  ;;  %v362_v34 = vadd.f32 %v1115_v61, %v1492_v37  ;;  %v523_v28 = vsel %vm456_vm1, %v446_v31, 0.0  ;;  %v449_v35 = vmul.f32 %v1485_v36, %v2023_v26 }
 0x100   :  { %v356_v32 = vpop.f32.mrf.mxu0  ;;  %524 = vadd.xlane.f32.xlu0 %v523_v28 }
 0x101   :  { %v412_v51 = vmax.f32 %v362_v34, 0.0  ;;  %v357_v27 = vadd.f32 %v1492_v37, %v356_v32  ;;  %v448_v56 = vmul.f32 %v1485_v36, %v409_v44  ;;  %v532_v32 = vsel %vm456_vm1, %v449_v35, 0.0 }
 0x102   :  { %v1118_v1 = vpop.f32.mrf.mxu0  ;;  %527 = vadd.xlane.f32.xlu1 %v526_v41 }
 0x103   :  { %v411_v29 = vmax.f32 %v357_v27, 0.0  ;;  %v372_v61 = vadd.f32 %v1118_v1, %v1492_v37  ;;  %v529_v31 = vsel %vm456_vm1, %v448_v56, 0.0  ;;  %v451_v28 = vmul.f32 %v1485_v36, %v412_v51 }
 0x104   :  { %v366_v25 = vpop.f32.mrf.mxu0  ;;  %530 = vadd.xlane.f32.xlu0 %v529_v31 }
 0x105   :  { %v414_v30 = vmax.f32 %v372_v61, 0.0  ;;  %v367_v34 = vadd.f32 %v1492_v37, %v366_v25  ;;  %v450_v24 = vmul.f32 %v1485_v36, %v411_v29  ;;  %v538_v56 = vsel %vm456_vm1, %v451_v28, 0.0 }
 0x106   :  { %v1121_v23 = vpop.f32.mrf.mxu0  ;;  %533 = vadd.xlane.f32.xlu1 %v532_v32 }
 0x107   :  { %v413_v26 = vmax.f32 %v367_v34, 0.0  ;;  %v382_v27 = vadd.f32 %v1121_v23, %v1492_v37  ;;  %v535_v41 = vsel %vm456_vm1, %v450_v24, 0.0  ;;  %v453_v35 = vmul.f32 %v1485_v36, %v414_v30 }
 0x108   :  { %v376_v1 = vpop.f32.mrf.mxu0  ;;  %536 = vadd.xlane.f32.xlu0 %v535_v41  ;;  %v2024_v23 = vmax.f32 %v1597_v55, 0.0  ;;  %v2026_v41 = vmax.f32 %v1581_v40, 0.0  ;;  %v2030_v40 = vmax.f32 %v1677_v4, 0.0  ;;  %v2035_v4 = vmax.f32 %v1667_v60, 0.0 }
 0x109   :  { %v416_v31 = vmax.f32 %v382_v27, 0.0  ;;  %v377_v61 = vadd.f32 %v1492_v37, %v376_v1  ;;  %v452_v25 = vmul.f32 %v1485_v36, %v413_v26  ;;  %v544_v24 = vsel %vm456_vm1, %v453_v35, 0.0 }
 0x10a   :  { %539 = vadd.xlane.f32.xlu1 %v538_v56  ;;  %v2025_v27 = vmax.f32 %v1603_v62, 0.0  ;;  %v2028_v62 = vmax.f32 %v1565_v3, 0.0  ;;  %v2032_v3 = vmax.f32 %v1557_v57, 0.0  ;;  %v2037_v57 = vmax.f32 %v1645_v53, 0.0 }
 0x10b   :  { %v415_v22 = vmax.f32 %v377_v61, 0.0  ;;  %1032 = vmatprep.subr.msk.mxu1 %vm456_vm1, %v416_v31  ;;  %v541_v34 = vsel %vm456_vm1, %v452_v25, 0.0  ;;  %v455_v28 = vmul.f32 %v1485_v36, %v416_v31  ;;  %v2040_v60 = vmax.f32 %v1526_v59, 0.0 }
 0x10c   :  { %1033 = vmatpush3.xpose.msk.msra.mxu1 %vm456_vm1, %v2024_v23  ;;  %542 = vadd.xlane.f32.xlu0 %v541_v34  ;;  %v2042_v53 = vmax.f32 %v1503_v45, 0.0  ;;  %v2045_v59 = vmax.f32 %v1613_v58, 0.0  ;;  %v2047_v45 = vmax.f32 %v1621_v52, 0.0 }
 0x10d   :  { %1034 = vmatprep.subr.msk.mxu1 %vm456_vm1, %v415_v22  ;;  %v454_v37 = vmul.f32 %v1485_v36, %v415_v22  ;;  %v550_v55 = vsel %vm456_vm1, %v455_v28, 0.0  ;;  %v2027_v22 = vmax.f32 %v1589_v48, 0.0  ;;  %v2031_v48 = vmax.f32 %v1549_v50, 0.0 }
 0x10e   :  { %545 = vadd.xlane.f32.xlu1 %v544_v24  ;;  %v2036_v50 = vmax.f32 %v1539_v38, 0.0  ;;  %v2041_v38 = vmax.f32 %v1629_v46, 0.0  ;;  %v2046_v46 = vmax.f32 %v1495_v39, 0.0 }
 0x10f   :  { %v547_v32 = vsel %vm456_vm1, %v454_v37, 0.0 }
 0x110   :  { %1035 = vmatpush3.xpose.msk.msra.mxu1 %vm456_vm1, %v2025_v27  ;;  %548 = vadd.xlane.f32.xlu0 %v547_v32 }
 0x111   :  { %1036 = vmatprep.subr.msk.mxu1 %vm456_vm1, %v414_v30  ;;  %v2029_v30 = vmax.f32 %v1571_v43, 0.0  ;;  %v2034_v43 = vmax.f32 %v1534_v0, 0.0  ;;  %v2039_v0 = vmax.f32 %v1653_v33, 0.0  ;;  %v2044_v33 = vmax.f32 %v1510_v49, 0.0 }
 0x112   :  { %551 = vadd.xlane.f32.xlu1 %v550_v55 }
 0x114   :  { %1037 = vmatpush3.xpose.msk.msra.mxu1 %vm456_vm1, %v2026_v41 }
 0x115   :  { %1038 = vmatprep.subr.msk.mxu1 %vm456_vm1, %v413_v26 }
 0x118   :  { %1039 = vmatpush3.xpose.msk.msra.mxu1 %vm456_vm1, %v2027_v22 }
 0x119   :  { %1040 = vmatprep.subr.msk.mxu1 %vm456_vm1, %v412_v51  ;;  %v2033_v51 = vmax.f32 %v1661_v47, 0.0  ;;  %v2038_v47 = vmax.f32 %v1518_v54, 0.0  ;;  %v2043_v54 = vmax.f32 %v1635_v63, 0.0  ;;  %v2048_v63 = vmax.f32 %v1499_v42, 0.0 }
 0x11c   :  { %1041 = vmatpush3.xpose.msk.msra.mxu1 %vm456_vm1, %v2028_v62 }
 0x11d   :  { %1042 = vmatprep.subr.msk.mxu1 %vm456_vm1, %v411_v29 }
 0x120   :  { %1043 = vmatpush3.xpose.msk.msra.mxu1 %vm456_vm1, %v2029_v30 }
 0x121   :  { %1044 = vmatprep.subr.msk.mxu1 %vm456_vm1, %v2030_v40 }
 0x124   :  { %1045 = vmatpush3.xpose.msk.msra.mxu1 %vm456_vm1, %v2031_v48 }
 0x125   :  { %1046 = vmatprep.subr.msk.mxu1 %vm456_vm1, %v409_v44 }
 0x128   :  { %1047 = vmatpush3.xpose.msk.msra.mxu1 %vm456_vm1, %v2032_v3 }
 0x129   :  { %1048 = vmatprep.subr.msk.mxu1 %vm456_vm1, %v2033_v51 }
 0x12c   :  { %1049 = vmatpush3.xpose.msk.msra.mxu1 %vm456_vm1, %v2034_v43 }
 0x12d   :  { %1050 = vmatprep.subr.msk.mxu1 %vm456_vm1, %v2035_v4 }
 0x130   :  { %1051 = vmatpush3.xpose.msk.msra.mxu1 %vm456_vm1, %v2036_v50 }
 0x131   :  { %1052 = vmatprep.subr.msk.mxu1 %vm456_vm1, %v2037_v57 }
 0x134   :  { %1053 = vmatpush3.xpose.msk.msra.mxu1 %vm456_vm1, %v2038_v47 }
 0x135   :  { %1054 = vmatprep.subr.msk.mxu1 %vm456_vm1, %v2039_v0 }
 0x138   :  { %1055 = vmatpush3.xpose.msk.msra.mxu1 %vm456_vm1, %v2040_v60 }
 0x139   :  { %1056 = vmatprep.subr.msk.mxu1 %vm456_vm1, %v2041_v38 }
 0x13c   :  { %1057 = vmatpush3.xpose.msk.msra.mxu1 %vm456_vm1, %v2042_v53 }
 0x13d   :  { %1058 = vmatprep.subr.msk.mxu1 %vm456_vm1, %v2043_v54 }
 0x140   :  { %1059 = vmatpush3.xpose.msk.msra.mxu1 %vm456_vm1, %v2044_v33 }
 0x141   :  { %1060 = vmatprep.subr.msk.mxu1 %vm456_vm1, %v2045_v59 }
 0x144   :  { %1061 = vmatpush3.xpose.msk.msra.mxu1 %vm456_vm1, %v2046_v46 }
 0x145   :  { %1062 = vmatprep.subr.msk.mxu1 %vm456_vm1, %v2047_v45 }
 0x148   :  { %1063 = vmatpush3.xpose.msk.msra.mxu1 %vm456_vm1, %v2048_v63 }
 0x14b   :  { %1065 = vmatmul.mubr.msk.f32.vlgmr.msra.gmra.mxu1 %vm456_vm1, %v1485_v36 }
 0x15b   :  { %v462_v49 = vpop.xlane.xlu0 %461 }
 0x15c   :  { %v554_v44 = vsub.f32 %v462_v49, %v462_v49 }
 0x15e   :  { %v587_v58 = vmul.f32 1.442695, %v554_v44 }
 0x15f   :  { %v468_v29 = vpop.xlane.xlu1 %467  ;;  %v459_v26 = vpop.xlane.xlu0 %458 }
 0x160   :  { %1124 = vpow2.f32 %v587_v58  ;;  %v556_v39 = vsub.f32 %v468_v29, %v468_v29  ;;  %v553_v1 = vsub.f32 %v459_v26, %v459_v26 }
 0x162   :  { %v591_v56 = vmul.f32 1.442695, %v556_v39  ;;  %v585_v31 = vmul.f32 1.442695, %v553_v1 }
 0x163   :  { %v465_v52 = vpop.xlane.xlu1 %464 }
 0x164   :  { %1126 = vpow2.f32 %v591_v56  ;;  %v555_v61 = vsub.f32 %v465_v52, %v465_v52 }
 0x165   :  { %1128 = vpow2.f32 %v585_v31  ;;  %v471_v42 = vpop.xlane.xlu0 %470 }
 0x166   :  { %v589_v25 = vmul.f32 1.442695, %v555_v61  ;;  %v557_v35 = vsub.f32 %v471_v42, %v471_v42 }
 0x167   :  { %v474_v34 = vpop.xlane.xlu1 %473 }
 0x168   :  { %1130 = vpow2.f32 %v589_v25  ;;  %v593_v36 = vmul.f32 1.442695, %v557_v35  ;;  %v558_v23 = vsub.f32 %v474_v34, %v474_v34 }
 0x169   :  { %v477_v24 = vpop.xlane.xlu0 %476 }
 0x16a   :  { %1132 = vpow2.f32 %v593_v36  ;;  %v595_v37 = vmul.f32 1.442695, %v558_v23  ;;  %v559_v28 = vsub.f32 %v477_v24, %v477_v24 }
 0x16b   :  { %v480_v32 = vpop.xlane.xlu1 %479 }
 0x16c   :  { %1134 = vpow2.f32 %v595_v37  ;;  %v597_v27 = vmul.f32 1.442695, %v559_v28  ;;  %v560_v55 = vsub.f32 %v480_v32, %v480_v32 }
 0x16d   :  { %v1125_v41 = vpop.eup %1124  ;;  %v483_v22 = vpop.xlane.xlu0 %482 }
 0x16e   :  { %v650_v62 = vmul.f32 %v1125_v41, %v1268_v5  ;;  %1136 = vpow2.f32 %v597_v27  ;;  %v599_v30 = vmul.f32 1.442695, %v560_v55  ;;  %v561_v40 = vsub.f32 %v483_v22, %v483_v22 }
 0x16f   :  { %v486_v48 = vpop.xlane.xlu1 %485 }
 0x170   :  { %682 = vst.msk [vmem:[%s1969_s4 + $0x8] sm:$0xff] %vm63_vm0, %v650_v62  ;;  %1138 = vpow2.f32 %v599_v30  ;;  %v601_v3 = vmul.f32 1.442695, %v561_v40  ;;  %v562_v51 = vsub.f32 %v486_v48, %v486_v48 }
 0x171   :  { %v1127_v43 = vpop.eup %1126  ;;  %v489_v4 = vpop.xlane.xlu0 %488 }
 0x172   :  { %v1129_v50 = vpop.eup %1128  ;;  %v652_v57 = vmul.f32 %v1127_v43, %v1282_v7  ;;  %1140 = vpow2.f32 %v601_v3  ;;  %v603_v47 = vmul.f32 1.442695, %v562_v51  ;;  %v563_v5 = vsub.f32 %v489_v4, %v489_v4 }
 0x173   :  { %v649_v0 = vmul.f32 %v1129_v50, %v1255_v2  ;;  %v492_v60 = vpop.xlane.xlu1 %491 }
 0x174   :  { %684 = vst.msk [vmem:[%s1969_s4 + $0x18] sm:$0xff] %vm63_vm0, %v652_v57  ;;  %1142 = vpow2.f32 %v603_v47  ;;  %v605_v38 = vmul.f32 1.442695, %v563_v5  ;;  %v564_v53 = vsub.f32 %v492_v60, %v492_v60 }
 0x175   :  { %v1131_v54 = vpop.eup %1130  ;;  %681 = vst.msk [vmem:[%s1969_s4] sm:$0xff] %vm63_vm0, %v649_v0  ;;  %v495_v7 = vpop.xlane.xlu0 %494 }
 0x176   :  { %v651_v33 = vmul.f32 %v1131_v54, %v1273_v6  ;;  %1144 = vpow2.f32 %v605_v38  ;;  %v607_v2 = vmul.f32 1.442695, %v564_v53  ;;  %v565_v59 = vsub.f32 %v495_v7, %v495_v7 }
 0x177   :  { %v1133_v46 = vpop.eup %1132  ;;  %v498_v45 = vpop.xlane.xlu1 %497 }
 0x178   :  { %683 = vst.msk [vmem:[%s1969_s4 + $0x10] sm:$0xff] %vm63_vm0, %v651_v33  ;;  %v653_v63 = vmul.f32 %v1133_v46, %v1287_v8  ;;  %1146 = vpow2.f32 %v607_v2  ;;  %v609_v49 = vmul.f32 1.442695, %v565_v59  ;;  %v566_v44 = vsub.f32 %v498_v45, %v498_v45 }
 0x179   :  { %v1135_v58 = vpop.eup %1134  ;;  %v501_v29 = vpop.xlane.xlu0 %500 }
 0x17a   :  { %685 = vst.msk [vmem:[%s1969_s4 + $0x20] sm:$0xff] %vm63_vm0, %v653_v63  ;;  %v654_v6 = vmul.f32 %v1135_v58, %v1296_v9  ;;  %1148 = vpow2.f32 %v609_v49  ;;  %v611_v26 = vmul.f32 1.442695, %v566_v44  ;;  %v567_v39 = vsub.f32 %v501_v29, %v501_v29 }
 0x17b   :  { %v1137_v1 = vpop.eup %1136  ;;  %v504_v56 = vpop.xlane.xlu1 %503 }
 0x17c   :  { %686 = vst.msk [vmem:[%s1969_s4 + $0x28] sm:$0xff] %vm63_vm0, %v654_v6  ;;  %v655_v8 = vmul.f32 %v1137_v1, %v1301_v10  ;;  %1150 = vpow2.f32 %v611_v26  ;;  %v613_v31 = vmul.f32 1.442695, %v567_v39  ;;  %v568_v52 = vsub.f32 %v504_v56, %v504_v56 }
 0x17d   :  { %v1139_v61 = vpop.eup %1138  ;;  %v507_v42 = vpop.xlane.xlu0 %506 }
 0x17e   :  { %687 = vst.msk [vmem:[%s1969_s4 + $0x30] sm:$0xff] %vm63_vm0, %v655_v8  ;;  %v656_v9 = vmul.f32 %v1139_v61, %v1310_v11  ;;  %1152 = vpow2.f32 %v613_v31  ;;  %v615_v25 = vmul.f32 1.442695, %v568_v52  ;;  %v569_v35 = vsub.f32 %v507_v42, %v507_v42 }
 0x17f   :  { %v1141_v34 = vpop.eup %1140  ;;  %v510_v36 = vpop.xlane.xlu1 %509 }
 0x180   :  { %688 = vst.msk [vmem:[%s1969_s4 + $0x38] sm:$0xff] %vm63_vm0, %v656_v9  ;;  %v657_v10 = vmul.f32 %v1141_v34, %v1315_v12  ;;  %1154 = vpow2.f32 %v615_v25  ;;  %v617_v23 = vmul.f32 1.442695, %v569_v35  ;;  %v570_v24 = vsub.f32 %v510_v36, %v510_v36  ;;  %v2051_v34 = vld [vmem:[#allocation7_spill] sm:$0xff] }
 0x181   :  { %v1143_v37 = vpop.eup %1142  ;;  %v513_v28 = vpop.xlane.xlu0 %512 }
 0x182   :  { %689 = vst.msk [vmem:[%s1969_s4 + $0x40] sm:$0xff] %vm63_vm0, %v657_v10  ;;  %v658_v11 = vmul.f32 %v1143_v37, %v1324_v13  ;;  %1156 = vpow2.f32 %v617_v23  ;;  %v619_v32 = vmul.f32 1.442695, %v570_v24  ;;  %v571_v27 = vsub.f32 %v513_v28, %v513_v28  ;;  %v2052_v28 = vld [vmem:[#allocation8_spill] sm:$0xff] }
 0x183   :  { %v1145_v55 = vpop.eup %1144  ;;  %v516_v41 = vpop.xlane.xlu1 %515 }
 0x184   :  { %690 = vst.msk [vmem:[%s1969_s4 + $0x48] sm:$0xff] %vm63_vm0, %v658_v11  ;;  %v659_v12 = vmul.f32 %v1145_v55, %v1329_v14  ;;  %1158 = vpow2.f32 %v619_v32  ;;  %v621_v22 = vmul.f32 1.442695, %v571_v27  ;;  %v572_v62 = vsub.f32 %v516_v41, %v516_v41 }
 0x185   :  { %v1147_v30 = vpop.eup %1146  ;;  %v519_v40 = vpop.xlane.xlu0 %518 }
 0x186   :  { %691 = vst.msk [vmem:[%s1969_s4 + $0x50] sm:$0xff] %vm63_vm0, %v659_v12  ;;  %v660_v13 = vmul.f32 %v1147_v30, %v1338_v15  ;;  %1160 = vpow2.f32 %v621_v22  ;;  %v623_v48 = vmul.f32 1.442695, %v572_v62  ;;  %v573_v3 = vsub.f32 %v519_v40, %v519_v40  ;;  %v2053_v12 = vld [vmem:[#allocation9_spill] sm:$0xff] }
 0x187   :  { %v1149_v51 = vpop.eup %1148  ;;  %v522_v43 = vpop.xlane.xlu1 %521 }
 0x188   :  { %692 = vst.msk [vmem:[%s1969_s4 + $0x58] sm:$0xff] %vm63_vm0, %v660_v13  ;;  %v661_v14 = vmul.f32 %v1149_v51, %v1343_v16  ;;  %1162 = vpow2.f32 %v623_v48  ;;  %v625_v4 = vmul.f32 1.442695, %v573_v3  ;;  %v574_v50 = vsub.f32 %v522_v43, %v522_v43  ;;  %v2054_v13 = vld [vmem:[#allocation10_spill] sm:$0xff]  ;;  %v2055_v43 = vld [vmem:[#allocation11_spill] sm:$0xff] }
 0x189   :  { %v1151_v57 = vpop.eup %1150  ;;  %v525_v47 = vpop.xlane.xlu0 %524 }
 0x18a   :  { %693 = vst.msk [vmem:[%s1969_s4 + $0x60] sm:$0xff] %vm63_vm0, %v661_v14  ;;  %v662_v15 = vmul.f32 %v1151_v57, %v1352_v17  ;;  %1164 = vpow2.f32 %v625_v4  ;;  %v627_v5 = vmul.f32 1.442695, %v574_v50  ;;  %v575_v0 = vsub.f32 %v525_v47, %v525_v47  ;;  %v2056_v50 = vld [vmem:[#allocation12_spill] sm:$0xff] }
 0x18b   :  { %v1153_v60 = vpop.eup %1152  ;;  %v528_v38 = vpop.xlane.xlu1 %527 }
 0x18c   :  { %694 = vst.msk [vmem:[%s1969_s4 + $0x68] sm:$0xff] %vm63_vm0, %v662_v15  ;;  %v663_v16 = vmul.f32 %v1153_v60, %v1357_v18  ;;  %1166 = vpow2.f32 %v627_v5  ;;  %v629_v53 = vmul.f32 1.442695, %v575_v0  ;;  %v576_v54 = vsub.f32 %v528_v38, %v528_v38  ;;  %v2057_v15 = vld [vmem:[#allocation13_spill] sm:$0xff]  ;;  %v2058_v60 = vld [vmem:[#allocation14_spill] sm:$0xff] }
 0x18d   :  { %v1155_v7 = vpop.eup %1154  ;;  %v531_v33 = vpop.xlane.xlu0 %530 }
 0x18e   :  { %695 = vst.msk [vmem:[%s1969_s4 + $0x70] sm:$0xff] %vm63_vm0, %v663_v16  ;;  %v664_v17 = vmul.f32 %v1155_v7, %v1366_v19  ;;  %1168 = vpow2.f32 %v629_v53  ;;  %v631_v2 = vmul.f32 1.442695, %v576_v54  ;;  %v577_v59 = vsub.f32 %v531_v33, %v531_v33  ;;  %v2059_v53 = vld [vmem:[#allocation15_spill] sm:$0xff]  ;;  %v2060_v33 = vld [vmem:[#allocation16_spill] sm:$0xff] }
 0x18f   :  { %v1157_v46 = vpop.eup %1156  ;;  %v534_v45 = vpop.xlane.xlu1 %533 }
 0x190   :  { %696 = vst.msk [vmem:[%s1969_s4 + $0x78] sm:$0xff] %vm63_vm0, %v664_v17  ;;  %v665_v18 = vmul.f32 %v1157_v46, %v1371_v20  ;;  %1170 = vpow2.f32 %v631_v2  ;;  %v633_v63 = vmul.f32 1.442695, %v577_v59  ;;  %v578_v49 = vsub.f32 %v534_v45, %v534_v45  ;;  %v2049_v20 = vld [vmem:[#allocation5_spill] sm:$0xff] }
 0x191   :  { %v1159_v44 = vpop.eup %1158  ;;  %v537_v58 = vpop.xlane.xlu0 %536  ;;  %v2061_v59 = vld [vmem:[#allocation17_spill] sm:$0xff] }
 0x192   :  { %697 = vst.msk [vmem:[%s1969_s4 + $0x80] sm:$0xff] %vm63_vm0, %v665_v18  ;;  %v666_v19 = vmul.f32 %v1159_v44, %v1380_v21  ;;  %1172 = vpow2.f32 %v633_v63  ;;  %v635_v29 = vmul.f32 1.442695, %v578_v49  ;;  %v579_v6 = vsub.f32 %v537_v58, %v537_v58  ;;  %v2050_v21 = vld [vmem:[#allocation6_spill] sm:$0xff] }
 0x193   :  { %v1161_v26 = vpop.eup %1160  ;;  %v540_v39 = vpop.xlane.xlu1 %539  ;;  %v2062_v18 = vld [vmem:[#allocation18_spill] sm:$0xff] }
 0x194   :  { %698 = vst.msk [vmem:[%s1969_s4 + $0x88] sm:$0xff] %vm63_vm0, %v666_v19  ;;  %v667_v1 = vmul.f32 %v1161_v26, %v2049_v20  ;;  %1174 = vpow2.f32 %v635_v29  ;;  %v637_v56 = vmul.f32 1.442695, %v579_v6  ;;  %v580_v8 = vsub.f32 %v540_v39, %v540_v39 }
 0x195   :  { %v1163_v31 = vpop.eup %1162  ;;  %v543_v52 = vpop.xlane.xlu0 %542  ;;  %v1214_v26 = vmov 1966171168   ;;  %v894_v20 = vlaneseq }
 0x196   :  { %699 = vst.msk [vmem:[%s1969_s4 + $0x90] sm:$0xff] %vm63_vm0, %v667_v1  ;;  %v668_v61 = vmul.f32 %v1163_v31, %v2050_v21  ;;  %1176 = vpow2.f32 %v637_v56  ;;  %v639_v42 = vmul.f32 1.442695, %v580_v8  ;;  %v581_v9 = vsub.f32 %v543_v52, %v543_v52 }
 0x197   :  { %v1165_v25 = vpop.eup %1164  ;;  %v546_v35 = vpop.xlane.xlu1 %545  ;;  %v892_v39 = vunpack.c.l.s4 %v1214_v26  ;;  %v895_v56 = vshrl.u32 %v894_v20, 7  ;;  %vm908_vm2 = vcmp.lt.s32.totalorder %v894_v20, 256 }
 0x198   :  { %700 = vst.msk [vmem:[%s1969_s4 + $0x98] sm:$0xff] %vm63_vm0, %v668_v61  ;;  %v669_v36 = vmul.f32 %v1165_v25, %v2051_v34  ;;  %1178 = vpow2.f32 %v639_v42  ;;  %v641_v10 = vmul.f32 1.442695, %v581_v9  ;;  %v582_v23 = vsub.f32 %v546_v35, %v546_v35 }
 0x199   :  { %v1167_v24 = vpop.eup %1166  ;;  %v549_v37 = vpop.xlane.xlu0 %548  ;;  %v893_v1 = vunpack.c.0.s8 %v892_v39 }
 0x19a   :  { %701 = vst.msk [vmem:[%s1969_s4 + $0xa0] sm:$0xff] %vm63_vm0, %v669_v36  ;;  %v670_v11 = vmul.f32 %v1167_v24, %v2052_v28  ;;  %1180 = vpow2.f32 %v641_v10  ;;  %v643_v32 = vmul.f32 1.442695, %v582_v23  ;;  %v583_v27 = vsub.f32 %v549_v37, %v549_v37 }
 0x19b   :  { %v1169_v55 = vpop.eup %1168  ;;  %v552_v41 = vpop.xlane.xlu1 %551  ;;  %v896_v31 = vsub.s32 %v893_v1, %v895_v56 }
 0x19c   :  { %702 = vst.msk [vmem:[%s1969_s4 + $0xa8] sm:$0xff] %vm63_vm0, %v670_v11  ;;  %v671_v22 = vmul.f32 %v1169_v55, %v2053_v12  ;;  %1182 = vpow2.f32 %v643_v32  ;;  %v645_v62 = vmul.f32 1.442695, %v583_v27  ;;  %v584_v30 = vsub.f32 %v552_v41, %v552_v41 }
 0x19d   :  { %v1171_v40 = vpop.eup %1170 }
 0x19e   :  { %703 = vst.msk [vmem:[%s1969_s4 + $0xb0] sm:$0xff] %vm63_vm0, %v671_v22  ;;  %v672_v48 = vmul.f32 %v1171_v40, %v2054_v13  ;;  %1184 = vpow2.f32 %v645_v62  ;;  %v647_v3 = vmul.f32 1.442695, %v584_v30 }
 0x19f   :  { %v1173_v51 = vpop.eup %1172 }
 0x1a0   :  { %704 = vst.msk [vmem:[%s1969_s4 + $0xb8] sm:$0xff] %vm63_vm0, %v672_v48  ;;  %v673_v14 = vmul.f32 %v1173_v51, %v2055_v43  ;;  %1186 = vpow2.f32 %v647_v3 }
 0x1a1   :  { %v1175_v4 = vpop.eup %1174 }
 0x1a2   :  { %705 = vst.msk [vmem:[%s1969_s4 + $0xc0] sm:$0xff] %vm63_vm0, %v673_v14  ;;  %v674_v57 = vmul.f32 %v1175_v4, %v2056_v50 }
 0x1a3   :  { %v1177_v47 = vpop.eup %1176 }
 0x1a4   :  { %706 = vst.msk [vmem:[%s1969_s4 + $0xc8] sm:$0xff] %vm63_vm0, %v674_v57  ;;  %v675_v5 = vmul.f32 %v1177_v47, %v2057_v15 }
 0x1a5   :  { %v1179_v0 = vpop.eup %1178 }
 0x1a6   :  { %707 = vst.msk [vmem:[%s1969_s4 + $0xd0] sm:$0xff] %vm63_vm0, %v675_v5  ;;  %v676_v38 = vmul.f32 %v1179_v0, %v2058_v60 }
 0x1a7   :  { %v1181_v16 = vpop.eup %1180 }
 0x1a8   :  { %708 = vst.msk [vmem:[%s1969_s4 + $0xd8] sm:$0xff] %vm63_vm0, %v676_v38  ;;  %v677_v54 = vmul.f32 %v1181_v16, %v2059_v53 }
 0x1a9   :  { %v1183_v7 = vpop.eup %1182 }
 0x1aa   :  { %709 = vst.msk [vmem:[%s1969_s4 + $0xe0] sm:$0xff] %vm63_vm0, %v677_v54  ;;  %v678_v17 = vmul.f32 %v1183_v7, %v2060_v33 }
 0x1ab   :  { %v1185_v2 = vpop.eup %1184 }
 0x1ac   :  { %710 = vst.msk [vmem:[%s1969_s4 + $0xe8] sm:$0xff] %vm63_vm0, %v678_v17  ;;  %v679_v46 = vmul.f32 %v1185_v2, %v2061_v59 }
 0x1ad   :  { %v1187_v45 = vpop.eup %1186 }
 0x1ae   :  { %711 = vst.msk [vmem:[%s1969_s4 + $0xf0] sm:$0xff] %vm63_vm0, %v679_v46  ;;  %v680_v63 = vmul.f32 %v1187_v45, %v2062_v18 }
 0x1b0   :  { %712 = vst.msk [vmem:[%s1969_s4 + $0xf8] sm:$0xff] %vm63_vm0, %v680_v63  ;;  %s1192_s4 = scalar_lea.vmem %s920_s20, 32 }
 0x1b1   :  { %p1193_p0 = scmp.ne.s32.totalorder %s920_s20, %s1192_s4  ;;  %p1198_p2 = scmp.lt.s32.totalorder %s1192_s4, %s1192_s4 }
 0x1b3   :  { %p1199_p3 = por %p1198_p2, %p1197_p1 }
 0x1b5   :  { %p1200_p4 = pnand %p1199_p3, %p1193_p0 }
 0x20b   :  { %v877_v49 = vpop.f32.mrf.mxu1 }
 0x20c   :  { %v882_v44 = vsub.f32 %v877_v49, %v877_v49 }
 0x20d   :  { %v879_v58 = vpop.f32.mrf.mxu1 }
 0x20e   :  { %v884_v19 = vmul.f32 1.442695, %v882_v44  ;;  %v883_v29 = vsub.f32 %v879_v58, %v879_v58 }
 0x210   :  { %v886_v6 = vmul.f32 1.442695, %v883_v29  ;;  %1188 = vpow2.f32 %v884_v19 }
 0x212   :  { %1190 = vpow2.f32 %v886_v6 }
 0x21d   :  { %v1189_v8 = vpop.eup %1188 }
 0x21f   :  { %v1191_v52 = vpop.eup %1190 }
 0x220   :  { %v890_v21 = vcombine.low %v1189_v8, %v1191_v52 }
 0x222   :  { %v897_v61 = vrot.slane %v890_v21, %v896_v31 }
 0x224   :  { %v904_v42 = vrot.slane %v897_v61, %v896_v31 }
 0x226   :  { %910 = vst.msk [vmem:[#allocation2] sm:$0x3] %vm908_vm2, %v904_v42 }
 0x227   :  { %1203 = shalt.err (!%p1200_p4)
}
 0x228   :  { %922 = dma.vmem_to_hbm [thread:$0]  %s920_s20, 32, %s1970_s5, [#allocation3]  }
 0x229   :  { %1212 = dma.done.wait [#allocation3], 32  }
 0x22a   :  { %1213 = vsyncadd [#allocation3], 4294967264 }
 0x22b   :  { %928 = vsyncpa [#allocation3], 1 }

</bundles_post_ra>
